<compile_context>
chip_gen: v6e
topology: v6e:2x2x1
jax: 0.10.0
libtpu: 0.0.40
codegen_flags: <defaults>
</compile_context>

<pallas_src>
import numpy as np

import jax
import jax.numpy as jnp
from jax.experimental import pallas as pl
from jax.experimental.pallas import tpu as pltpu

# one output tile = one vreg (8 sublanes x 128 lanes, f32)
_TILE_ROWS, _COLS = 8, 128

# kind codes (stored as f32 in the slab)
KIND_FLOAT = 0.0
KIND_INT = 1.0
KIND_BOOL = 2.0
KIND_CAT = 3.0

# field rows in the stacked input slab
NUM_FIELDS = 7
(F_PARAM, F_INVMUL, F_VMIN, F_VMAX, F_KIND, F_NCH, F_INVNCH) = range(NUM_FIELDS)


def _suggest_kernel(in_ref, out_ref):
    """Resolve raw optimizer params into suggested values (elementwise, VPU).

    in_ref : (NUM_FIELDS, _TILE_ROWS, _COLS) f32 stacked slab (single DMA).
    out_ref: (_TILE_ROWS, _COLS) f32 resolved values.
    """
    p = in_ref[F_PARAM]
    inv_mul = in_ref[F_INVMUL]
    vmin = in_ref[F_VMIN]
    vmax = in_ref[F_VMAX]
    kind = in_ref[F_KIND]
    nch = in_ref[F_NCH]
    inv_nch = in_ref[F_INVNCH]

    # optimizer sees param = value * mul  =>  value = param * (1/mul)
    base = p * inv_mul
    rounded = jnp.round(base)

    # float keeps base, int uses the rounded value; clip bounds were set to
    # +-inf on the host whenever clip_value is False, so the clip is a numeric
    # no-op there (no clip_value operand / select needed).
    v_scalar = jnp.clip(jnp.where(kind == KIND_FLOAT, base, rounded), vmin, vmax)

    # bool path: > 0
    v_bool = (base > 0.0).astype(jnp.float32)

    # categorical path: rolling index = rounded mod nch, computed with a
    # host-provided 1/nch to avoid the VPU divide. The reciprocal can make
    # floor land one step low when `rounded` is an exact multiple of nch
    # (yielding nch instead of 0); fold that back with one select.
    v_cat = rounded - jnp.floor(rounded * inv_nch) * nch
    v_cat = jnp.where(v_cat >= nch, v_cat - nch, v_cat)

    out_ref[...] = jnp.where(kind <= KIND_INT, v_scalar,
                   jnp.where(kind == KIND_BOOL, v_bool, v_cat))


@jax.jit
def resolve_suggestions(stacked):
    """stacked: (NUM_FIELDS, num_tiles*8, 128) f32 -> (num_tiles*8, 128) f32."""
    _, nrows, _ = stacked.shape
    num_tiles = nrows // _TILE_ROWS
    return pl.pallas_call(
        _suggest_kernel,
        out_shape=jax.ShapeDtypeStruct((nrows, _COLS), jnp.float32),
        grid_spec=pltpu.PrefetchScalarGridSpec(
            num_scalar_prefetch=0,
            grid=(num_tiles,),
            in_specs=[pl.BlockSpec((NUM_FIELDS, _TILE_ROWS, _COLS),
                                   lambda i: (0, i, 0))],
            out_specs=pl.BlockSpec((_TILE_ROWS, _COLS), lambda i: (i, 0)),
        ),
        compiler_params=pltpu.CompilerParams(
            dimension_semantics=("parallel",)),
    )(stacked)


class TrialPallas:
    """Minimal JAX analogue of torchzero Trial: collects suggested params and
    resolves them all with a single Pallas kernel call."""

    def __init__(self, key):
        self._key = key
        # (name, raw_param, inv_mul, vmin_clip, vmax_clip, kind, nch, inv_nch)
        self._entries = []
        self._names = {}

    def _next_key(self):
        self._key, sub = jax.random.split(self._key)
        return sub

    def _add(self, name, raw, inv_mul, vmin, vmax, kind, nch, inv_nch):
        if name in self._names:            # already suggested -> keep original
            return
        self._names[name] = len(self._entries)
        self._entries.append((name, float(raw), float(inv_mul), float(vmin),
                              float(vmax), float(kind), float(nch),
                              float(inv_nch)))

    def suggest_float(self, name, min=None, max=None, mul=1.0, init="uniform",
                      clip_value=False):
        lo = -1.0 if min is None else float(min)
        hi = 1.0 if max is None else float(max)
        if init == "uniform":
            value = float(jax.random.uniform(self._next_key(), (), jnp.float32,
                                             minval=lo, maxval=hi))
        else:
            value = float(init)
        raw = value * mul
        vmin = float(min) if (clip_value and min is not None) else -float("inf")
        vmax = float(max) if (clip_value and max is not None) else float("inf")
        self._add(name, raw, 1.0 / mul, vmin, vmax, KIND_FLOAT, 1.0, 1.0)

    def suggest_int(self, name, min=None, max=None, mul=0.01, init="uniform",
                    clip_value=True):
        lo = -1.0 if min is None else float(min)
        hi = 1.0 if max is None else float(max)
        if init == "uniform":
            value = float(jax.random.uniform(self._next_key(), (), jnp.float32,
                                             minval=lo, maxval=hi))
        else:
            value = float(init)
        raw = value * mul
        vmin = float(min) if (clip_value and min is not None) else -float("inf")
        vmax = float(max) if (clip_value and max is not None) else float("inf")
        self._add(name, raw, 1.0 / mul, vmin, vmax, KIND_INT, 1.0, 1.0)

    def suggest_bool(self, name, mul=0.01, init=0.0):
        raw = float(init) * mul
        self._add(name, raw, 1.0 / mul, -float("inf"), float("inf"),
                  KIND_BOOL, 1.0, 1.0)

    def suggest_categorical(self, name, choices, mul=0.01, init="uniform"):
        n = len(choices)
        if init == "uniform":
            value = float(jax.random.uniform(self._next_key(), (), jnp.float32,
                                             minval=0.0, maxval=float(n)))
        else:
            value = float(init)
        raw = value * mul
        self._add(name, raw, 1.0 / mul, -float("inf"), float("inf"),
                  KIND_CAT, float(n), 1.0 / float(n))

    def resolve(self):
        """Pack params into one stacked slab, run the kernel, return dict."""
        n = len(self._entries)
        num_tiles = max(1, -(-n // (_TILE_ROWS * _COLS)))
        size = num_tiles * _TILE_ROWS * _COLS

        stacked = np.zeros((NUM_FIELDS, size), dtype=np.float32)
        # pad fills chosen so padded slots are harmless (mul=1, nch=1, +-inf bounds)
        stacked[F_INVMUL] = 1.0
        stacked[F_VMIN] = -np.inf
        stacked[F_VMAX] = np.inf
        stacked[F_KIND] = KIND_FLOAT
        stacked[F_NCH] = 1.0
        stacked[F_INVNCH] = 1.0

        names = []
        for i, (name, raw, inv_mul, vmin, vmax, kind, nch, inv_nch) in \
                enumerate(self._entries):
            names.append(name)
            stacked[F_PARAM, i] = raw
            stacked[F_INVMUL, i] = inv_mul
            stacked[F_VMIN, i] = vmin
            stacked[F_VMAX, i] = vmax
            stacked[F_KIND, i] = kind
            stacked[F_NCH, i] = nch
            stacked[F_INVNCH, i] = inv_nch

        stacked = jnp.asarray(
            stacked.reshape(NUM_FIELDS, num_tiles * _TILE_ROWS, _COLS))

        out = resolve_suggestions(stacked)
        out = jax.block_until_ready(out)
        flat = np.asarray(out).reshape(-1)[:n]        # single D2H transfer
        return {name: float(v) for name, v in zip(names, flat)}


if __name__ == "__main__":
    key = jax.random.PRNGKey(0)
    trial = TrialPallas(key)

    # small, deterministic set of suggestions consistent with the Trial API
    trial.suggest_float("lr", min=1e-4, max=1e-1, mul=1.0, clip_value=True)
    trial.suggest_int("hidden", min=8, max=64, mul=0.01)
    trial.suggest_bool("use_bias", mul=0.01, init=0.0)
    trial.suggest_categorical("activation", ["relu", "gelu", "tanh"], mul=0.01)

    values = trial.resolve()

    # lightweight sanity checks against the reference semantics (plain python)
    assert 1e-4 - 1e-6 <= values["lr"] <= 1e-1 + 1e-6
    assert float(values["hidden"]).is_integer()
    assert 8 <= values["hidden"] <= 64
    assert values["use_bias"] in (0.0, 1.0)
    assert values["activation"] in (0.0, 1.0, 2.0)

    print("KERNEL_OK")
</pallas_src>

<mosaic_0001>
module attributes {stable_mosaic.version = 11 : i64} {
  func.func @_suggest_kernel(%arg0: i32, %arg1: memref<7x8x128xf32, #tpu.memory_space<vmem>>, %arg2: memref<8x128xf32, #tpu.memory_space<vmem>>) attributes {dimension_semantics = [#tpu.dimension_semantics<parallel>], iteration_bounds = array<i64: 1>, scalar_prefetch = 0 : i64, scratch_operands = 0 : i64, tpu.core_type = #tpu.core_type<tc>, window_params = [{transform_indices = @transform_0, window_bounds = array<i64: 7, 8, 128>}, {transform_indices = @transform_1, window_bounds = array<i64: 8, 128>}]} {
    %c0 = arith.constant 0 : index
    %c0_0 = arith.constant 0 : index
    %c0_1 = arith.constant 0 : index
    %0 = vector.load %arg1[%c0, %c0_0, %c0_1] : memref<7x8x128xf32, #tpu.memory_space<vmem>>, vector<1x8x128xf32>
    %1 = vector.shape_cast %0 : vector<1x8x128xf32> to vector<8x128xf32>
    %c1 = arith.constant 1 : index
    %c0_2 = arith.constant 0 : index
    %c0_3 = arith.constant 0 : index
    %2 = vector.load %arg1[%c1, %c0_2, %c0_3] : memref<7x8x128xf32, #tpu.memory_space<vmem>>, vector<1x8x128xf32>
    %3 = vector.shape_cast %2 : vector<1x8x128xf32> to vector<8x128xf32>
    %c2 = arith.constant 2 : index
    %c0_4 = arith.constant 0 : index
    %c0_5 = arith.constant 0 : index
    %4 = vector.load %arg1[%c2, %c0_4, %c0_5] : memref<7x8x128xf32, #tpu.memory_space<vmem>>, vector<1x8x128xf32>
    %5 = vector.shape_cast %4 : vector<1x8x128xf32> to vector<8x128xf32>
    %c3 = arith.constant 3 : index
    %c0_6 = arith.constant 0 : index
    %c0_7 = arith.constant 0 : index
    %6 = vector.load %arg1[%c3, %c0_6, %c0_7] : memref<7x8x128xf32, #tpu.memory_space<vmem>>, vector<1x8x128xf32>
    %7 = vector.shape_cast %6 : vector<1x8x128xf32> to vector<8x128xf32>
    %c4 = arith.constant 4 : index
    %c0_8 = arith.constant 0 : index
    %c0_9 = arith.constant 0 : index
    %8 = vector.load %arg1[%c4, %c0_8, %c0_9] : memref<7x8x128xf32, #tpu.memory_space<vmem>>, vector<1x8x128xf32>
    %9 = vector.shape_cast %8 : vector<1x8x128xf32> to vector<8x128xf32>
    %c5 = arith.constant 5 : index
    %c0_10 = arith.constant 0 : index
    %c0_11 = arith.constant 0 : index
    %10 = vector.load %arg1[%c5, %c0_10, %c0_11] : memref<7x8x128xf32, #tpu.memory_space<vmem>>, vector<1x8x128xf32>
    %11 = vector.shape_cast %10 : vector<1x8x128xf32> to vector<8x128xf32>
    %c6 = arith.constant 6 : index
    %c0_12 = arith.constant 0 : index
    %c0_13 = arith.constant 0 : index
    %12 = vector.load %arg1[%c6, %c0_12, %c0_13] : memref<7x8x128xf32, #tpu.memory_space<vmem>>, vector<1x8x128xf32>
    %13 = vector.shape_cast %12 : vector<1x8x128xf32> to vector<8x128xf32>
    %14 = arith.mulf %1, %3 : vector<8x128xf32>
    %15 = math.roundeven %14 : vector<8x128xf32>
    %cst = arith.constant 0.000000e+00 : f32
    %16 = vector.broadcast %cst : f32 to vector<8x128xf32>
    %17 = arith.cmpf oeq, %9, %16 : vector<8x128xf32>
    %18 = arith.select %17, %14, %15 : vector<8x128xi1>, vector<8x128xf32>
    %19 = arith.maximumf %5, %18 : vector<8x128xf32>
    %20 = arith.minimumf %7, %19 : vector<8x128xf32>
    %cst_14 = arith.constant 0.000000e+00 : f32
    %21 = vector.broadcast %cst_14 : f32 to vector<8x128xf32>
    %22 = arith.cmpf ogt, %14, %21 : vector<8x128xf32>
    %23 = arith.extui %22 : vector<8x128xi1> to vector<8x128xi32>
    %24 = arith.sitofp %23 : vector<8x128xi32> to vector<8x128xf32>
    %25 = arith.mulf %15, %13 : vector<8x128xf32>
    %26 = math.floor %25 : vector<8x128xf32>
    %27 = arith.mulf %26, %11 : vector<8x128xf32>
    %28 = arith.subf %15, %27 : vector<8x128xf32>
    %29 = arith.cmpf oge, %28, %11 : vector<8x128xf32>
    %30 = arith.subf %28, %11 : vector<8x128xf32>
    %31 = arith.select %29, %30, %28 : vector<8x128xi1>, vector<8x128xf32>
    %cst_15 = arith.constant 1.000000e+00 : f32
    %32 = vector.broadcast %cst_15 : f32 to vector<8x128xf32>
    %33 = arith.cmpf ole, %9, %32 : vector<8x128xf32>
    %cst_16 = arith.constant 2.000000e+00 : f32
    %34 = vector.broadcast %cst_16 : f32 to vector<8x128xf32>
    %35 = arith.cmpf oeq, %9, %34 : vector<8x128xf32>
    %36 = arith.select %35, %24, %31 : vector<8x128xi1>, vector<8x128xf32>
    %37 = arith.select %33, %20, %36 : vector<8x128xi1>, vector<8x128xf32>
    %c0_17 = arith.constant 0 : index
    %c0_18 = arith.constant 0 : index
    %38 = vector.load %arg2[%c0_17, %c0_18] : memref<8x128xf32, #tpu.memory_space<vmem>>, vector<8x128xf32>
    tpu.vector_store %arg2[%c0_17, %c0_18], %37 {strides = array<i32>} : memref<8x128xf32, #tpu.memory_space<vmem>>, vector<8x128xf32>,
    return
  }
  func.func @transform_0(%arg0: i32) -> (i32, i32, i32) {
    %c0_i32 = arith.constant 0 : i32
    %c0_i32_0 = arith.constant 0 : i32
    %c0_i32_1 = arith.constant 0 : i32
    return %c0_i32, %arg0, %c0_i32_0 : i32, i32, i32
  }
  func.func @transform_1(%arg0: i32) -> (i32, i32) {
    %c0_i32 = arith.constant 0 : i32
    %c0_i32_0 = arith.constant 0 : i32
    return %arg0, %c0_i32 : i32, i32
  }
}

</mosaic_0001>

<bundles_post_ra>
// kernel: resolve_suggestions.1
= control target key start
LH: loop header
LB: loop body
LE: loop exit
PB: predicated region body
PF: predicated region fallthrough
CT: control target
= control target key end

     0   :  { %6 = vsyncpa [#allocation3], 0  ;;  %s151_s0 = inlined_call_operand.hbm [shape: f32[7,8,128], index: 0, kind: input, shape index: {}]   ;;  %s152_s1 = inlined_call_operand.hbm [shape: f32[8,128], index: 1, kind: output, shape index: {}]  }
   0x1   :  { %7 = vsyncpa [#allocation4], 0  ;;  %s130_s6 = smov [#allocation2]  }
   0x2   :  { %s13_s7 = sshll.u32 %s130_s6, 4  ;;  %s14_s7 = int_to_ptr.vmem [resolvable:$true] %s13_s7 }
   0x3   :  { %s94_s8 = scalar_lea.vmem %s14_s7, 896  ;;  %p99_p1 = scmp.lt.s32.totalorder %s14_s7, %s14_s7 }
   0x4   :  { %p95_p0 = scmp.ne.s32.totalorder %s14_s7, %s94_s8  ;;  %p100_p2 = scmp.lt.s32.totalorder %s94_s8, %s94_s8 }
   0x6   :  { %p101_p3 = por %p100_p2, %p99_p1 }
   0x8   :  { %p102_p4 = pnand %p101_p3, %p95_p0 }
   0xa   :  { %105 = shalt.err (!%p102_p4)
}
   0xb   :  { %s131_s9 = smov 128   ;;  %s132_s10 = smov 8  }
   0xc   :  { %19 = dma.hbm_to_vmem [thread:$0]  %s151_s0, 896, %s14_s7, [#allocation3], %s131_s9, %s131_s9, %s132_s10  }
   0xd   :  { %126 = dma.done.wait [#allocation3], 896  }
   0xe   :  { %127 = vsyncadd [#allocation3], 4294966400  ;;  %v23_v0 = vld [vmem:[#allocation2] sm:$0xff]  ;;  %v25_v1 = vld [vmem:[#allocation2 + $0x8] sm:$0xff]  ;;  %v133_v22 = vmov 0.0   ;;  %s134_s0 = smov [#allocation5]  }
   0xf   :  { %v36_v2 = vmul.f32 %v25_v1, %v23_v0  ;;  %v31_v7 = vld [vmem:[#allocation2 + $0x20] sm:$0xff]  ;;  %v35_v9 = vld [vmem:[#allocation2 + $0x30] sm:$0xff]  ;;  %v33_v14 = vld [vmem:[#allocation2 + $0x28] sm:$0xff]  ;;  %s63_s13 = sshll.u32 %s134_s0, 4  ;;  %s64_s13 = int_to_ptr.vmem [resolvable:$true] %s63_s13 }
  0x10   :  { %vm38_vm1 = vcmp.eq.f32.partialorder %v31_v7, 0.0  ;;  %v27_v13 = vld [vmem:[#allocation2 + $0x10] sm:$0xff]  ;;  %v29_v19 = vld [vmem:[#allocation2 + $0x18] sm:$0xff]  ;;  %vm53_vm3 = vcmp.eq.f32.partialorder %v31_v7, 2.0  ;;  %vm52_vm5 = vcmp.le.f32.partialorder %v31_v7, 1.0  ;;  %s106_s14 = scalar_lea.vmem %s64_s13, 128  ;;  %p111_p6 = scmp.lt.s32.totalorder %s64_s13, %s64_s13 }
  0x11   :  { %v75_v3 = vcvt.f32.s32 %v36_v2  ;;  %v73_v4 = vand.u32 2147483647, %v36_v2  ;;  %v78_v6 = vand.u32 2147483648, %v36_v2  ;;  %vm42_vm2 = vcmp.gt.f32.partialorder %v36_v2, 0.0  ;;  %p107_p5 = scmp.ne.s32.totalorder %s64_s13, %s106_s14  ;;  %p112_p7 = scmp.lt.s32.totalorder %s106_s14, %s106_s14 }
  0x12   :  { %v72_v23 = vsel %vm42_vm2, 1.0, %v133_v22 }
  0x13   :  { %v76_v5 = vcvt.s32.f32 %v75_v3  ;;  %vm74_vm0 = vcmp.lt.f32.partialorder %v73_v4, 8388608.0  ;;  %p113_p8 = por %p112_p7, %p111_p6 }
  0x15   :  { %v77_v8 = vand.u32 2147483647, %v76_v5  ;;  %p114_p9 = pnand %p113_p8, %p107_p5 }
  0x17   :  { %v79_v10 = vor.u32 %v78_v6, %v77_v8 }
  0x19   :  { %v80_v11 = vsel %vm74_vm0, %v79_v10, %v36_v2 }
  0x1a   :  { %v45_v12 = vmul.f32 %v80_v11, %v35_v9  ;;  %v39_v15 = vsel %vm38_vm1, %v36_v2, %v80_v11 }
  0x1b   :  { %v40_v17 = vmax.f32 %v27_v13, %v39_v15 }
  0x1c   :  { %v46_v16 = vfloor.f32 %v45_v12 }
  0x1d   :  { %v41_v21 = vmin.f32 %v29_v19, %v40_v17 }
  0x1e   :  { %v47_v18 = vmul.f32 %v46_v16, %v33_v14 }
  0x20   :  { %v48_v20 = vsub.f32 %v80_v11, %v47_v18 }
  0x22   :  { %vm49_vm4 = vcmp.ge.f32.partialorder %v48_v20, %v33_v14  ;;  %v50_v24 = vsub.f32 %v48_v20, %v33_v14 }
  0x24   :  { %v51_v25 = vsel %vm49_vm4, %v50_v24, %v48_v20 }
  0x25   :  { %v54_v26 = vsel %vm53_vm3, %v72_v23, %v51_v25 }
  0x26   :  { %v55_v27 = vsel %vm52_vm5, %v41_v21, %v54_v26 }
  0x27   :  { %56 = vst [vmem:[#allocation5] sm:$0xff] %v55_v27 }
  0x28   :  { %117 = shalt.err (!%p114_p9)
}
  0x29   :  { %66 = dma.vmem_to_hbm [thread:$0]  %s64_s13, 128, %s152_s1, [#allocation4]  }
  0x2a   :  { %128 = dma.done.wait [#allocation4], 128  }
  0x2b   :  { %129 = vsyncadd [#allocation4], 4294967168 }
  0x2c   :  { %70 = vsyncpa [#allocation3], 1 }
  0x2d   :  { %71 = vsyncpa [#allocation4], 1 }

</bundles_post_ra>
